<compile_context>
chip_gen: v7x
topology: tpu7x:2x2x1
jax: 0.10.0
libtpu: 0.0.40
codegen_flags: <defaults>
</compile_context>

<pallas_src>
import functools

import jax
import jax.numpy as jnp
from jax.experimental import pallas as pl
from jax.experimental.pallas import tpu as pltpu


# ---------------------------------------------------------------------------
# helpers
# ---------------------------------------------------------------------------

def _round_up(v, m):
    return (v + m - 1) // m * m


def _compiler_params():
    # 32 MiB scoped VMEM is <= the default/physical limit on v5e/v6e/v7x; tiles are
    # sized so double-buffered blocks stay well under it even for real ECAPA widths.
    return pltpu.CompilerParams(
        dimension_semantics=("parallel", "parallel"),
        vmem_limit_bytes=32 * 1024 * 1024,
    )


# ---------------------------------------------------------------------------
# kernels
# ---------------------------------------------------------------------------

def _conv_relu_stats_kernel(x_ref, w_ref, b_ref, y_ref, stats_ref, *,
                            K, dilation, TL, L, Lp, pad, x_tiled):
    """Pass 1 of a TDNN block: conv ('same', reflect-padded input) + bias + ReLU.

    Also emits per-(batch, time-tile) partial sums / sums-of-squares so BatchNorm
    batch statistics can be finished in the wrapper (two-pass BN).
    """
    t = pl.program_id(1)
    cout = y_ref.shape[-1]

    if x_tiled:
        # K == 1: the BlockSpec already delivered exactly this tile's rows.
        xt = x_ref[...]                                      # (TL, Cin)
    else:
        # K > 1: the (small, per-branch) padded sequence is resident; take this
        # tile's halo'd window with an 8-aligned dynamic offset.
        off = pl.multiple_of(t * TL, 8)
        xt = x_ref[pl.ds(off, TL + 2 * pad), :]              # (TL + 2*pad, Cin)

    # Conv1d as K shifted 2-D matmuls on the MXU (default precision, f32 accumulate).
    acc = jnp.zeros((TL, cout), jnp.float32)
    for k in range(K):
        xs = xt if K == 1 else xt[k * dilation:k * dilation + TL, :]
        acc = acc + jnp.dot(xs, w_ref[k], preferred_element_type=jnp.float32)
    acc = acc + b_ref[...].astype(jnp.float32)

    y = jnp.maximum(acc, 0.0)                                # ReLU
    y_ref[...] = y.astype(y_ref.dtype)

    # Partial BN statistics (mask rows beyond the true length L of the tail tile).
    if Lp == L:
        ym = y
    else:
        row = t * TL + jax.lax.broadcasted_iota(jnp.int32, (TL, 1), 0)
        ym = jnp.where(row < L, y, 0.0)
    stats_ref[0:1, :] = jnp.sum(ym, axis=0, keepdims=True)       # sum(y)
    stats_ref[1:2, :] = jnp.sum(ym * y, axis=0, keepdims=True)   # sum(y^2)


def _affine_kernel(y_ref, scale_ref, shift_ref, o_ref):
    """Pass 2 of a TDNN block: BN as a per-channel affine (scale/shift precomputed)."""
    o_ref[...] = (y_ref[...].astype(jnp.float32) * scale_ref[...]
                  + shift_ref[...]).astype(o_ref.dtype)


def _affine_gate_res_kernel(y_ref, gate_ref, res_ref, scale_ref, shift_ref, o_ref):
    """Fused: BN affine + SE channel gate + residual add (final pass of the block)."""
    h = y_ref[...].astype(jnp.float32) * scale_ref[...] + shift_ref[...]
    o_ref[...] = (gate_ref[...] * h
                  + res_ref[...].astype(jnp.float32)).astype(o_ref.dtype)


def _pointwise_conv_kernel(x_ref, w_ref, b_ref, o_ref):
    """1x1 conv (shortcut projection): a single tile-sized MXU matmul + bias."""
    acc = jnp.dot(x_ref[...], w_ref[...], preferred_element_type=jnp.float32)
    o_ref[...] = (acc + b_ref[...]).astype(o_ref.dtype)


# ---------------------------------------------------------------------------
# pallas_call wrappers
# ---------------------------------------------------------------------------

def _conv_relu_stats(x_nlc, w_kio, b, *, dilation, TL, L):
    """Conv('same', reflect) + ReLU over a (batch, time-tile) grid; returns the
    post-ReLU activations (padded to a tile multiple) and per-tile BN partial sums."""
    N, _, Cin = x_nlc.shape
    K, _, Cout = w_kio.shape
    assert K % 2 == 1, "SpeechBrain 'same' padding assumed with odd kernel size"
    pad = dilation * (K - 1) // 2
    nLT = pl.cdiv(L, TL)
    Lp = nLT * TL

    if K == 1:
        x_in = x_nlc if Lp == L else jnp.pad(x_nlc, ((0, 0), (0, Lp - L), (0, 0)))
        x_spec = pl.BlockSpec((None, TL, Cin), lambda n, t: (n, t, 0))
    else:
        # reflect halo for 'same' conv, then zero-pad the tail up to a tile multiple.
        xr = jnp.pad(x_nlc, ((0, 0), (pad, pad), (0, 0)), mode="reflect")
        x_in = xr if Lp == L else jnp.pad(xr, ((0, 0), (0, Lp - L), (0, 0)))
        Ltot = Lp + 2 * pad
        # Halo'd tile windows overlap, so the (small per-branch) sequence is kept
        # resident per batch element and sliced dynamically inside the kernel.
        x_spec = pl.BlockSpec((None, Ltot, Cin), lambda n, t: (n, 0, 0))

    kern = functools.partial(
        _conv_relu_stats_kernel,
        K=K, dilation=dilation, TL=TL, L=L, Lp=Lp, pad=pad, x_tiled=(K == 1))

    y, stats = pl.pallas_call(
        kern,
        grid=(N, nLT),
        in_specs=[x_spec,
                  pl.BlockSpec((K, Cin, Cout), lambda n, t: (0, 0, 0)),
                  pl.BlockSpec((1, Cout), lambda n, t: (0, 0))],
        out_specs=[pl.BlockSpec((None, TL, Cout), lambda n, t: (n, t, 0)),
                   pl.BlockSpec((None, None, 2, Cout), lambda n, t: (n, t, 0, 0))],
        out_shape=[jax.ShapeDtypeStruct((N, Lp, Cout), x_nlc.dtype),
                   jax.ShapeDtypeStruct((N, nLT, 2, Cout), jnp.float32)],
        compiler_params=_compiler_params(),
    )(x_in, w_kio, b.reshape(1, Cout))
    return y, stats


def _bn_affine_from_stats(stats, gamma, beta, *, L, eps):
    """Finish training-mode BN from per-tile partial sums (tiny C-length math)."""
    N = stats.shape[0]
    ssum = stats[:, :, 0, :].sum(axis=(0, 1))
    ssq = stats[:, :, 1, :].sum(axis=(0, 1))
    count = N * L
    mean = ssum / count
    var = jnp.maximum(ssq / count - mean * mean, 0.0)
    scale = gamma * jax.lax.rsqrt(var + eps)
    shift = beta - mean * scale
    per_n_mean = stats[:, :, 0, :].sum(axis=1) / L        # (N, C): mean_t of pre-BN y
    return scale, shift, per_n_mean


def _apply_affine(y, scale, shift, *, TL):
    N, Lp, C = y.shape
    nLT = Lp // TL
    return pl.pallas_call(
        _affine_kernel,
        grid=(N, nLT),
        in_specs=[pl.BlockSpec((None, TL, C), lambda n, t: (n, t, 0)),
                  pl.BlockSpec((1, C), lambda n, t: (0, 0)),
                  pl.BlockSpec((1, C), lambda n, t: (0, 0))],
        out_specs=pl.BlockSpec((None, TL, C), lambda n, t: (n, t, 0)),
        out_shape=jax.ShapeDtypeStruct((N, Lp, C), y.dtype),
        compiler_params=_compiler_params(),
    )(y, scale.reshape(1, C), shift.reshape(1, C))


def _bn_se_residual(y, gate, residual_p, scale, shift, *, TL):
    N, Lp, C = y.shape
    nLT = Lp // TL
    return pl.pallas_call(
        _affine_gate_res_kernel,
        grid=(N, nLT),
        in_specs=[pl.BlockSpec((None, TL, C), lambda n, t: (n, t, 0)),
                  pl.BlockSpec((None, 1, C), lambda n, t: (n, 0, 0)),
                  pl.BlockSpec((None, TL, C), lambda n, t: (n, t, 0)),
                  pl.BlockSpec((1, C), lambda n, t: (0, 0)),
                  pl.BlockSpec((1, C), lambda n, t: (0, 0))],
        out_specs=pl.BlockSpec((None, TL, C), lambda n, t: (n, t, 0)),
        out_shape=jax.ShapeDtypeStruct((N, Lp, C), y.dtype),
        compiler_params=_compiler_params(),
    )(y, gate, residual_p, scale.reshape(1, C), shift.reshape(1, C))


def _pointwise_conv(x_p, w_oik, b, *, TL):
    """1x1 conv (shortcut) on an already tile-padded (N, Lp, Cin) input."""
    N, Lp, Cin = x_p.shape
    Cout = w_oik.shape[0]
    w_io = jnp.transpose(w_oik[:, :, 0], (1, 0))          # (Cin, Cout)
    nLT = Lp // TL
    return pl.pallas_call(
        _pointwise_conv_kernel,
        grid=(N, nLT),
        in_specs=[pl.BlockSpec((None, TL, Cin), lambda n, t: (n, t, 0)),
                  pl.BlockSpec((Cin, Cout), lambda n, t: (0, 0)),
                  pl.BlockSpec((1, Cout), lambda n, t: (0, 0))],
        out_specs=pl.BlockSpec((None, TL, Cout), lambda n, t: (n, t, 0)),
        out_shape=jax.ShapeDtypeStruct((N, Lp, Cout), x_p.dtype),
        compiler_params=_compiler_params(),
    )(x_p, w_io, b.reshape(1, Cout))


def _tdnn_block(x_nlc, w_oik, b, gamma, beta, *, dilation, TL, eps):
    """Full TDNN block: Conv1d('same', reflect) -> ReLU -> BatchNorm1d (batch stats)."""
    L = x_nlc.shape[1]
    w_kio = jnp.transpose(w_oik, (2, 1, 0))               # (K, Cin, Cout)
    y, stats = _conv_relu_stats(x_nlc, w_kio, b, dilation=dilation, TL=TL, L=L)
    scale, shift, _ = _bn_affine_from_stats(stats, gamma, beta, L=L, eps=eps)
    return _apply_affine(y, scale, shift, TL=TL)[:, :L, :]


# ---------------------------------------------------------------------------
# SERes2NetBlock forward
# ---------------------------------------------------------------------------

def se_res2net_block(x_ncl, params, *, res2net_scale, dilation, eps=1e-5,
                     time_tile=256):
    """Forward pass of SERes2NetBlock. x_ncl: (N, Cin, L); returns (N, Cout, L)."""
    N, Cin, L = x_ncl.shape
    Cout = params["tdnn1"]["w"].shape[0]
    assert Cout % res2net_scale == 0

    TL = min(_round_up(time_tile, 8), _round_up(L, 8))
    nLT = pl.cdiv(L, TL)
    Lp = nLT * TL

    # Single NCL -> NLC transpose at block entry (channels on the lane dim).
    x = jnp.transpose(x_ncl, (0, 2, 1)).astype(jnp.float32)
    x_p = x if Lp == L else jnp.pad(x, ((0, 0), (0, Lp - L), (0, 0)))

    # Residual path (kept tile-padded so it can be fused into the final kernel).
    if "shortcut" in params:
        residual_p = _pointwise_conv(x_p, params["shortcut"]["w"],
                                     params["shortcut"]["b"], TL=TL)
    else:
        assert Cin == Cout
        residual_p = x_p

    # tdnn1 (1x1 conv + ReLU + BN)
    p = params["tdnn1"]
    h = _tdnn_block(x, p["w"], p["b"], p["gamma"], p["beta"],
                    dilation=1, TL=TL, eps=eps)

    # Res2Net multi-scale block (channel chunking/concat is cheap wrapper glue).
    c = Cout // res2net_scale
    ys, prev = [h[:, :, :c]], None
    for i in range(1, res2net_scale):
        xi = h[:, :, i * c:(i + 1) * c]
        inp = xi if i == 1 else xi + prev
        pb = params["res2net"][i - 1]
        prev = _tdnn_block(inp, pb["w"], pb["b"], pb["gamma"], pb["beta"],
                           dilation=dilation, TL=TL, eps=eps)
        ys.append(prev)
    hr = jnp.concatenate(ys, axis=-1)

    # tdnn2: conv+ReLU+partial-stats pass, then one fused BN + SE-gate + residual pass.
    p2 = params["tdnn2"]
    w2_kio = jnp.transpose(p2["w"], (2, 1, 0))
    y2, stats2 = _conv_relu_stats(hr, w2_kio, p2["b"], dilation=1, TL=TL, L=L)
    scale2, shift2, per_n_mean = _bn_affine_from_stats(
        stats2, p2["gamma"], p2["beta"], L=L, eps=eps)

    # SE squeeze: mean over time of the *normalized* tdnn2 output, obtained
    # analytically from the pass-1 partial sums (BN is affine) -> no extra HBM pass.
    se = params["se"]
    s = per_n_mean * scale2[None, :] + shift2[None, :]                 # (N, Cout)
    s = jax.nn.relu(s @ se["w1"][:, :, 0].T + se["b1"])                # (N, se)
    gate = jax.nn.sigmoid(s @ se["w2"][:, :, 0].T + se["b2"])          # (N, Cout)
    gate = gate[:, None, :].astype(jnp.float32)

    out_p = _bn_se_residual(y2, gate, residual_p, scale2, shift2, TL=TL)
    return jnp.transpose(out_p[:, :L, :], (0, 2, 1))                   # back to NCL


# ---------------------------------------------------------------------------
# Pure-JAX reference (PyTorch semantics, f32/HIGHEST precision) for self-check
# ---------------------------------------------------------------------------

def _ref_conv1d(x_ncl, w_oik, b, dilation):
    K = w_oik.shape[-1]
    pad = dilation * (K - 1) // 2
    xp = jnp.pad(x_ncl, ((0, 0), (0, 0), (pad, pad)), mode="reflect") if pad else x_ncl
    y = jax.lax.conv_general_dilated(
        xp, w_oik, window_strides=(1,), padding="VALID", rhs_dilation=(dilation,),
        dimension_numbers=("NCH", "OIH", "NCH"), precision=jax.lax.Precision.HIGHEST)
    return y + b[None, :, None]


def _ref_bn_train(y, gamma, beta, eps):
    mean = jnp.mean(y, axis=(0, 2), keepdims=True)
    var = jnp.mean(jnp.square(y - mean), axis=(0, 2), keepdims=True)
    return ((y - mean) * jax.lax.rsqrt(var + eps) * gamma[None, :, None]
            + beta[None, :, None])


def _ref_tdnn(x, p, dilation, eps):
    return _ref_bn_train(jnp.maximum(_ref_conv1d(x, p["w"], p["b"], dilation), 0.0),
                         p["gamma"], p["beta"], eps)


def se_res2net_block_ref(x_ncl, params, *, res2net_scale, dilation, eps=1e-5):
    Cout = params["tdnn1"]["w"].shape[0]
    residual = (_ref_conv1d(x_ncl, params["shortcut"]["w"], params["shortcut"]["b"], 1)
                if "shortcut" in params else x_ncl)
    h = _ref_tdnn(x_ncl, params["tdnn1"], 1, eps)
    c = Cout // res2net_scale
    ys, prev = [], None
    for i in range(res2net_scale):
        xi = h[:, i * c:(i + 1) * c, :]
        if i == 0:
            yi = xi
        elif i == 1:
            yi = _ref_tdnn(xi, params["res2net"][0], dilation, eps)
        else:
            yi = _ref_tdnn(xi + prev, params["res2net"][i - 1], dilation, eps)
        ys.append(yi)
        prev = yi
    h = jnp.concatenate(ys, axis=1)
    h = _ref_tdnn(h, params["tdnn2"], 1, eps)
    se = params["se"]
    s = jnp.mean(h, axis=2)
    s = jax.nn.relu(s @ se["w1"][:, :, 0].T + se["b1"])
    g = jax.nn.sigmoid(s @ se["w2"][:, :, 0].T + se["b2"])
    return g[:, :, None] * h + residual


# ---------------------------------------------------------------------------
# demo / self-check
# ---------------------------------------------------------------------------

if __name__ == "__main__":
    N, Cin, Cout, L = 2, 16, 32, 30
    res2net_scale, se_channels, K, dilation = 4, 16, 3, 2
    c = Cout // res2net_scale

    key = jax.random.PRNGKey(0)
    ks = jax.random.split(key, 16)

    def nrm(k, shape, scale=0.1):
        return scale * jax.random.normal(k, shape, dtype=jnp.float32)

    params = {
        "tdnn1": {"w": nrm(ks[0], (Cout, Cin, 1)), "b": nrm(ks[1], (Cout,)),
                  "gamma": 1.0 + nrm(ks[2], (Cout,)), "beta": nrm(ks[3], (Cout,))},
        "res2net": [],
        "tdnn2": {"w": nrm(ks[4], (Cout, Cout, 1)), "b": nrm(ks[5], (Cout,)),
                  "gamma": 1.0 + nrm(ks[6], (Cout,)), "beta": nrm(ks[7], (Cout,))},
        "se": {"w1": nrm(ks[8], (se_channels, Cout, 1)), "b1": nrm(ks[9], (se_channels,)),
               "w2": nrm(ks[10], (Cout, se_channels, 1)), "b2": nrm(ks[11], (Cout,))},
        # Cin != Cout -> shortcut 1x1 projection is active (matches the module).
        "shortcut": {"w": nrm(ks[12], (Cout, Cin, 1)), "b": nrm(ks[13], (Cout,))},
    }
    kb = jax.random.split(ks[14], 4 * (res2net_scale - 1))
    for i in range(res2net_scale - 1):
        params["res2net"].append({
            "w": nrm(kb[4 * i], (c, c, K)), "b": nrm(kb[4 * i + 1], (c,)),
            "gamma": 1.0 + nrm(kb[4 * i + 2], (c,)), "beta": nrm(kb[4 * i + 3], (c,))})

    x = jax.random.normal(ks[15], (N, Cin, L), dtype=jnp.float32)   # PyTorch NCL

    # time_tile=16 (< L) so the demo exercises the multi-tile grid + tail masking.
    out = se_res2net_block(x, params, res2net_scale=res2net_scale,
                           dilation=dilation, eps=1e-5, time_tile=16)
    out = jax.block_until_ready(out)

    ref = se_res2net_block_ref(x, params, res2net_scale=res2net_scale,
                               dilation=dilation, eps=1e-5)

    assert out.shape == (N, Cout, L), out.shape
    # Kernel uses default MXU precision (bf16 multiplies, f32 accumulate) per the
    # perf review; reference uses full-f32 precision, hence the tolerance.
    max_err = float(jnp.max(jnp.abs(out - ref)))
    assert jnp.allclose(out, ref, atol=3e-2, rtol=3e-2), max_err
    print("KERNEL_OK")
</pallas_src>

<mosaic_0001>
module attributes {stable_mosaic.version = 11 : i64} {
  func.func @_pointwise_conv_kernel(%arg0: i32, %arg1: i32, %arg2: memref<1x16x16xf32, #tpu.memory_space<vmem>>, %arg3: memref<16x32xf32, #tpu.memory_space<vmem>>, %arg4: memref<1x32xf32, #tpu.memory_space<vmem>>, %arg5: memref<1x16x32xf32, #tpu.memory_space<vmem>>) attributes {dimension_semantics = [#tpu.dimension_semantics<parallel>, #tpu.dimension_semantics<parallel>], iteration_bounds = array<i64: 2, 2>, scalar_prefetch = 0 : i64, scratch_operands = 0 : i64, tpu.core_type = #tpu.core_type<tc>, window_params = [{transform_indices = @transform_0, window_bounds = array<i64: 1, 16, 16>}, {pipeline_mode = #tpu.pipeline_mode<synchronous>, transform_indices = @transform_1, window_bounds = array<i64: 16, 32>}, {pipeline_mode = #tpu.pipeline_mode<synchronous>, transform_indices = @transform_2, window_bounds = array<i64: 1, 32>}, {transform_indices = @transform_3, window_bounds = array<i64: 1, 16, 32>}]} {
    %c0 = arith.constant 0 : index
    %c0_0 = arith.constant 0 : index
    %c0_1 = arith.constant 0 : index
    %0 = vector.load %arg2[%c0, %c0_0, %c0_1] : memref<1x16x16xf32, #tpu.memory_space<vmem>>, vector<1x16x16xf32>
    %1 = vector.shape_cast %0 : vector<1x16x16xf32> to vector<16x16xf32>
    %c0_2 = arith.constant 0 : index
    %c0_3 = arith.constant 0 : index
    %2 = vector.load %arg3[%c0_2, %c0_3] : memref<16x32xf32, #tpu.memory_space<vmem>>, vector<16x32xf32>
    %cst = arith.constant dense<0.000000e+00> : vector<16x32xf32>
    %3 = tpu.matmul %1, %2, %cst {dimension_numbers = #tpu.dot_dimension_numbers<[1], [0], [0], [1], [0, 0, 1, 1], [], []>} : vector<16x16xf32>, vector<16x32xf32>, vector<16x32xf32> -> vector<16x32xf32>
    %c0_4 = arith.constant 0 : index
    %c0_5 = arith.constant 0 : index
    %4 = vector.load %arg4[%c0_4, %c0_5] : memref<1x32xf32, #tpu.memory_space<vmem>>, vector<1x32xf32>
    %5 = vector.broadcast %4 : vector<1x32xf32> to vector<16x32xf32>
    %6 = arith.addf %3, %5 : vector<16x32xf32>
    %c0_6 = arith.constant 0 : index
    %c0_7 = arith.constant 0 : index
    %c0_8 = arith.constant 0 : index
    %7 = vector.load %arg5[%c0_6, %c0_7, %c0_8] : memref<1x16x32xf32, #tpu.memory_space<vmem>>, vector<1x16x32xf32>
    %8 = vector.shape_cast %7 : vector<1x16x32xf32> to vector<16x32xf32>
    %9 = vector.shape_cast %6 : vector<16x32xf32> to vector<1x16x32xf32>
    tpu.vector_store %arg5[%c0_6, %c0_7, %c0_8], %9 {strides = array<i32>} : memref<1x16x32xf32, #tpu.memory_space<vmem>>, vector<1x16x32xf32>,
    return
  }
  func.func @transform_0(%arg0: i32, %arg1: i32) -> (i32, i32, i32) {
    %c0_i32 = arith.constant 0 : i32
    %c0_i32_0 = arith.constant 0 : i32
    return %arg0, %arg1, %c0_i32 : i32, i32, i32
  }
  func.func @transform_1(%arg0: i32, %arg1: i32) -> (i32, i32) {
    %c0_i32 = arith.constant 0 : i32
    %c0_i32_0 = arith.constant 0 : i32
    %c0_i32_1 = arith.constant 0 : i32
    return %c0_i32, %c0_i32_0 : i32, i32
  }
  func.func @transform_2(%arg0: i32, %arg1: i32) -> (i32, i32) {
    %c0_i32 = arith.constant 0 : i32
    %c0_i32_0 = arith.constant 0 : i32
    %c0_i32_1 = arith.constant 0 : i32
    return %c0_i32, %c0_i32_0 : i32, i32
  }
  func.func @transform_3(%arg0: i32, %arg1: i32) -> (i32, i32, i32) {
    %c0_i32 = arith.constant 0 : i32
    %c0_i32_0 = arith.constant 0 : i32
    return %arg0, %arg1, %c0_i32 : i32, i32, i32
  }
}

</mosaic_0001>

<bundles_post_ra>
// kernel: tpu_custom_call.1
= control target key start
LH: loop header
LB: loop body
LE: loop exit
PB: predicated region body
PF: predicated region fallthrough
CT: control target
= control target key end

     0   :  { %s766_s0 = inlined_call_operand.vmem [shape: f32[2,32,16], index: 0, kind: input, shape index: {}]   ;;  %s767_s1 = inlined_call_operand.vmem [shape: f32[16,32], index: 1, kind: input, shape index: {}]   ;;  %s768_s2 = inlined_call_operand.vmem [shape: f32[1,32], index: 2, kind: input, shape index: {}]   ;;  %s769_s3 = inlined_call_operand.hbm [shape: f32[2,32,32], index: 3, kind: output, shape index: {}]  }
   0x1   :  { %770 = sst [smem:[#allocation5_spill]] %s767_s1 }
   0x2   :  { %8 = vsyncpa [#allocation3], 0 }
   0x3   :  { %10 = vsyncpa [#allocation3 + $0x1], 0  ;;  %s619_s12 = smov 0   ;;  %s621_s13 = smov 0  }
   0x4   :  { %s623_s14 = smov 0   ;;  %s625_s15 = smov 0  }
   0x5   :  { %s627_s16 = smov 0   ;;  %s629_s17 = smov 0  }
   0x6   :  { %s631_s18 = smov 0   ;;  %s633_s19 = smov 0  }
   0x7 LB: > { %s394_s20 = sadd.s32 4294967295, %s594_s19   ;;  %s395_s21 = sadd.s32 4294967294, %s594_s19   ;;  %s594_s19 = sphi %s633_s19, %s16_s19   ;;  %s590_s18 = sphi %s631_s18, %s780_s18   ;;  %s586_s17 = sphi %s629_s17, %s779_s17   ;;  %s582_s16 = sphi %s627_s16, %s778_s16   ;;  %s578_s15 = sphi %s625_s15, %s777_s15   ;;  %s574_s14 = sphi %s623_s14, %s776_s14   ;;  %s570_s13 = sphi %s621_s13, %s775_s13   ;;  %s566_s12 = sphi %s619_s12, %s774_s12  }
   0x8   : > { %s25_s22 = sadd.s32 1, %s586_s17  ;;  %s28_s23 = sadd.s32 1, %s590_s18 }
   0x9   : > { %p26_p0 = scmp.ge.s32.totalorder %s25_s22, 2  ;;  %p117_p1 = scmp.ne.s32.totalorder %s574_s14, %s570_s13 }
   0xa   : > { %p118_p2 = scmp.eq.s32.totalorder %s394_s20, 3  ;;  %p123_p5 = scmp.ne.s32.totalorder %s570_s13, %s566_s12 }
   0xb   : > { %s782_s22 = smov (%p26_p0, %s25_s22), 0  ;;  %s784_s23 = smov (!%p26_p0, %s28_s23), %s590_s18 }
   0xc   : > { %s103_s24 = ssub.s32 %s586_s17, %s782_s22  ;;  %p670_p3 = por %p118_p2, %p117_p1 }
   0xd   : > { %p30_p4 = scmp.ge.s32.totalorder %s784_s23, 2  ;;  %p124_p6 = scmp.eq.s32.totalorder %s395_s21, 3 }
   0xe   : > { %p398_p7 = scmp.ge.s32.totalorder %s594_s19, 1  ;;  %p161_p9 = scmp.lt.s32.totalorder %s594_s19, 5 }
   0xf   : > { %s786_s23 = smov (%p30_p4, %s784_s23), 0  ;;  %p679_p8 = por %p124_p6, %p123_p5 }
  0x10   : > { %s102_s27 = ssub.s32 %s590_s18, %s786_s23  ;;  %s107_s28 = sadd.s32 1, %s574_s14 }
  0x11   : > { %s104_s29 = sor.u32 %s103_s24, %s102_s27  ;;  %p162_p10 = pnand %p398_p7, %p161_p9 }
  0x12   : > { %p105_p11 = scmp.eq.s32.totalorder %s104_s29, 0  ;;  %s773_s1 = sld [smem:[#allocation5_spill]] (!%p162_p10)  ;;  %vm211_vm0 = vcmask (!%p162_p10), 130048   ;;  %v403_v5 = vld [vmem:[%s768_s2] ss:$0 sm:$0xff] (!%p162_p10)  ;;  %vm293_vm1 = vcmask (!%p162_p10), 261120  }
  0x13   : > { %165 = sbr.rel (%p162_p10) target bundleno = 264 (0x108), region = 32  ;;  %s400_s8 = sshll.u32 (!%p162_p10), %s578_s15, 1 }
  0x14   : > { %s688_s30 = scalar_select %p105_p11, %s574_s14, %s107_s28  }
  0x15   : > { %p190_p12 = scmp.lt.s32.totalorder (!%p162_p10), %s582_s16, 1  ;;  %p192_p13 = scmp.lt.s32.totalorder (!%p162_p10), %s400_s8, 3 }
  0x16   : > { %s186_s15 = sand.u32 (!%p162_p10), 1, %s570_s13   ;;  %s408_s29 = sshll.u32 (!%p162_p10), %s582_s16, 2 }
  0x17   : > { %s399_s4 = sshll.u32 (!%p162_p10), %s186_s15, 4  ;;  %s309_s5 = sadd.s32 (!%p162_p10), %s408_s29, %s400_s8 }
  0x18   : > { %v202_v0 = vld [vmem:[%s773_s1] sm:$0xff] (!%p162_p10)  ;;  %v203_v1 = vld [vmem:[%s773_s1 + $0x8] sm:$0xff] (!%p162_p10)  ;;  %s409_s6 = sshll.u32 (!%p162_p10), %s309_s5, 7  ;;  %s714_s1 = scalar_lea.sflag (!%p162_p10), [#allocation3], %s186_s15 }
  0x19   : > { %v423_v2 = vpack.c.bf16 (!%p162_p10), %v203_v1, %v202_v0 }
  0x1a   : > { %s191_s9 = scalar_select %p190_p12, %s582_s16, 1 }
  0x1b   : > { %424 = vmatprep.subr.bf16.mxu0 %v423_v2  ;;  %s193_s10 = scalar_select %p192_p13, %s400_s8, 3 }
  0x1c   : > { %426 = vmatpush3.bf16.msra.mxu0 %v423_v2  ;;  %s401_s11 = sshll.u32 %s191_s9, 2  ;;  %s188_s9 = scalar_lea.vmem [#allocation2], %s399_s4 }
  0x1d   : > { %s195_s20 = sadd.s32 %s401_s11, %s193_s10  ;;  %s312_s10 = sshll.u32 %s188_s9, 4  ;;  %s712_s10 = int_to_ptr.vmem [resolvable:$true] %s312_s10 }
  0x1e   : > { %s402_s21 = sshll.u32 %s195_s20, 3  ;;  %s500_s16 = scalar_lea.vmem %s712_s10, 256 }
  0x1f   : > { %s197_s28 = scalar_lea.vmem %s766_s0, %s402_s21  ;;  %s710_s21 = scalar_lea.hbm %s769_s3, %s409_s6 }
  0x20   : > { %v200_v3 = vld [vmem:[%s197_s28] sm:$0xff]  ;;  %v201_v4 = vld [vmem:[%s197_s28 + $0x8] sm:$0xff]  ;;  %p501_p0 = scmp.ne.s32.totalorder %s712_s10, %s500_s16  ;;  %s596_s8 = smov [#allocation2]  }
  0x21   : > { %420 = vmatprep.mubr.msk.f32.mxu0 %vm211_vm0, %v200_v3  ;;  %s504_s24 = sshll.u32 %s596_s8, 4  ;;  %s505_s24 = int_to_ptr.vmem [resolvable:$false] %s504_s24 }
  0x22   : > { %421 = vmatmul.mubr.msk.f32.vlgmr.msra.gmra.mrb[0].mxu0 %vm211_vm0, %v201_v4  ;;  %p502_p1 = pnand %p501_p0, %p670_p3  ;;  %s506_s27 = scalar_lea.vmem %s505_s24, 512 }
  0x23   : > { %p507_p4 = scmp.lt.s32.totalorder %s712_s10, %s505_s24  ;;  %p508_p5 = scmp.lt.s32.totalorder %s506_s27, %s500_s16 }
  0x24   : > { %p503_p2 = pneg %p502_p1 }
  0x25   : > { %p509_p6 = por %p508_p5, %p507_p4 }
  0x27   : > { %p510_p7 = pnand %p509_p6, %p503_p2 }
  0xf5   : > { %v422_v6 = vpop.f32.mrb[0].mxu0 }
  0xf6   : > { %v290_v7 = vadd.f32 %v422_v6, %v403_v5  ;;  %v284_v8 = vpop.f32.mrb[1].mxu0 }
  0xf7   : > { %v285_v9 = vadd.f32 %v403_v5, %v284_v8 }
  0xf8   : > { %295 = vst.msk [vmem:[%s188_s9 + $0x8] sm:$0xff] %vm293_vm1, %v290_v7 }
  0xf9   : > { %294 = vst.msk [vmem:[%s188_s9] sm:$0xff] %vm293_vm1, %v285_v9 }
  0xfa   : > { %513 = shalt.err (!%p510_p7)
}
  0xfb   : > { %s514_s28 = scalar_lea.hbm %s710_s21, 256  ;;  %s518_s4 = scalar_lea.hbm %s769_s3, 1024 }
  0xfc   : > { %p515_p9 = scmp.ne.s32.totalorder %s710_s21, %s514_s28  ;;  %p519_p12 = scmp.lt.u32.totalorder %s710_s21, %s769_s3 }
  0xfd   : > { %p520_p13 = scmp.lt.u32.totalorder %s518_s4, %s514_s28  ;;  %p522_p1 = scmp.lt.u32.totalorder %s514_s28, %s710_s21 }
  0xfe   : > { %p516_p10 = pnand %p515_p9, %p670_p3 }
  0xff   : > { %p521_p0 = por %p520_p13, %p519_p12 }
 0x100   : > { %p517_p11 = pneg %p516_p10 }
 0x101   : > { %p523_p2 = por %p522_p1, %p521_p0 }
 0x103   : > { %p524_p4 = pnand %p523_p2, %p517_p11 }
 0x105   : > { %527 = shalt.err (!%p524_p4)
}
 0x106   : > { %s597_s7 = smov 128   ;;  %s598_s9 = smov 8  }
 0x107   : > { %427 = dma.vmem_to_hbm [thread:$0]  (%p670_p3), %s712_s10, 256, %s710_s21, %s714_s1, %s597_s7, %s597_s7, %s598_s9  }
 0x108 PF: > { %p433_p5 = scmp.ge.s32.totalorder %s594_s19, 2  ;;  %s327_s11 = sand.u32 1, %s566_s12  }
 0x109   : > { %s328_s20 = scalar_lea.sflag [#allocation3], %s327_s11 }
 0x10a   : > { %p430_p6 = pnand %p433_p5, %p679_p8 }
 0x10c   : > { %561 = dma.done.wait (!%p430_p6), %s328_s20, 256  }
 0x10d   : > { %563 = vsyncadd (!%p430_p6), %s328_s20, 4294967040  ;;  %s16_s19 = sadd.s32 1, %s594_s19   ;;  %s774_s12 = smov %s570_s13 }
 0x10e   : > { %p13_p7 = scmp.ge.s32.totalorder %s16_s19, 6   ;;  %s775_s13 = smov %s574_s14 }
 0x10f   : > { %s776_s14 = smov %s688_s30  ;;  %s777_s15 = smov %s586_s17 }
 0x110   : > { %s778_s16 = smov %s590_s18  ;;  %s779_s17 = smov %s782_s22 }
 0x111   : > { %s780_s18 = smov %s786_s23  ;;  %15 = sbr.rel (!%p13_p7) target bundleno = 7 (0x7), region = 67 }
 0x118   :  { %333 = vsyncpa [#allocation3], 1 }
 0x119   :  { %335 = vsyncpa [#allocation3 + $0x1], 1 }

</bundles_post_ra>
